<compile_context>
chip_gen: v6e
topology: v6e:2x2x1
jax: 0.10.0
libtpu: 0.0.40
codegen_flags: <defaults>
</compile_context>

<pallas_src>
import jax
import jax.numpy as jnp
import numpy as np
from jax.experimental import pallas as pl
from jax.experimental.pallas import tpu as pltpu

# ---------------- configuration (small, consistent with the module) ----------
STATE_DIM = 12
NUM_TASKS = 4
MTOBS_DIM = STATE_DIM + NUM_TASKS          # 16
DIM_CTX = 16                               # output_dim_contextEnc  (= z_context dim)
DIM_MIX = 16                               # output_dim_mixtureEnc
POLICY_IN = DIM_CTX + DIM_MIX              # 32
ACTION_DIM = 4
HIDDEN = 32                                # actor_hidden_dim = [32, 32]
NUM_EXPERTS = 4
BATCH = 8

# fused stage-1 output columns: [expert encodings | attn logits | z-part of h1 | 0-pad]
S1_ENC = NUM_EXPERTS * DIM_MIX             # 64
S1_LOG = NUM_EXPERTS                       # 4
S1_H1Z = HIDDEN                            # 32
S1_COLS = S1_ENC + S1_LOG + S1_H1Z         # 100  (< 128 lanes -> one vreg wide)

SLAB_LANES = 128                           # every stored block is full lane width

# weight-slab row layout (every block starts on a sublane (x8) boundary)
ROW_W1 = 0                                 # [32, 128]  fused stage-1 weight
ROW_B1 = 32                                # [1, 128]   fused stage-1 bias
ROW_E = 40                                 # [4, 128]   0/1 expert-expansion matrix
ROW_W1M = 48                               # [128,128]  tiled w1m + identity pass-through
ROW_W2 = 176                               # [128,128]  h1 -> h2 (zero-padded rows/cols)
ROW_B2 = 304                               # [1, 128]
ROW_W3 = 312                               # [128,128]  h2 -> (mu|log_std) (zero-padded)
ROW_B3 = 440                               # [1, 128]
SLAB_ROWS = 448                            # multiple of 8

# batch tile per grid step (256 fills the v6e/v7x 256-wide MXU; use 128 on v5e)
MAX_TILE_B = 256


def _round_up(x, m):
    return -(-x // m) * m


# ---------------------------- Pallas kernel ----------------------------------
def actor_kernel(xin_ref, w_ref, out_ref):
    # xin = [mtobss | z_context]  -> [TILE_B, 32]
    xin = xin_ref[...]
    tb = xin.shape[0]

    # full-128-lane weight views: plain unmasked vector loads, no hidden copies
    W1 = w_ref[ROW_W1:ROW_W1 + POLICY_IN, :]           # [32, 128]
    b1 = w_ref[ROW_B1:ROW_B1 + 1, :]                   # [1, 128]
    E = w_ref[ROW_E:ROW_E + NUM_EXPERTS, :]            # [4, 128]
    W1M = w_ref[ROW_W1M:ROW_W1M + SLAB_LANES, :]       # [128, 128]
    W2 = w_ref[ROW_W2:ROW_W2 + SLAB_LANES, :]          # [128, 128]
    b2 = w_ref[ROW_B2:ROW_B2 + 1, :]                   # [1, 128]
    W3 = w_ref[ROW_W3:ROW_W3 + SLAB_LANES, :]          # [128, 128]
    b3 = w_ref[ROW_B3:ROW_B3 + 1, :]                   # [1, 128]

    lane = jax.lax.broadcasted_iota(jnp.int32, (tb, SLAB_LANES), 1)

    # ---- fused stage 1: expert encoders + attention logits + z-part of h1 ----
    s1 = jnp.dot(xin, W1, preferred_element_type=jnp.float32) + b1   # [TB, 128]

    # softmax over the K experts (max-subtracted); only 4-lane slice needed
    logits = s1[:, S1_ENC:S1_ENC + S1_LOG]                           # [TB, 4]
    logits = logits - jnp.max(logits, axis=-1, keepdims=True)
    ew = jnp.exp(logits)
    # exact reciprocal kept: review flags pl.reciprocal(approx=True) may break
    # the tight f32 tolerance check against the pure-JAX reference.
    attn = ew / jnp.sum(ew, axis=-1, keepdims=True)                  # [TB, 4]

    # expand attn to the 64 encoder lanes on the otherwise-idle MXU instead of
    # 4 per-expert cross-lane broadcasts (E is 0/1; lanes 64:128 of attn_b = 0)
    attn_b = jnp.dot(attn, E, preferred_element_type=jnp.float32)    # [TB, 128]

    # lanes 0:64  -> attention-weighted relu(expert encodings)
    # lanes 64:128-> raw s1, so the z-part of layer 1 (lanes 68:100, already
    #                includes b1) rides through the next matmul via an
    #                identity block in W1M; logit lanes hit zero rows.
    lhs2 = jnp.where(lane < S1_ENC, attn_b * jnp.maximum(s1, 0.0), s1)

    # ---- policy MLP (all intermediates stay lane-dense at 128 lanes) ----
    h1 = jnp.maximum(jnp.dot(lhs2, W1M, preferred_element_type=jnp.float32), 0.0)
    h2 = jnp.maximum(jnp.dot(h1, W2, preferred_element_type=jnp.float32) + b2, 0.0)
    head = jnp.dot(h2, W3, preferred_element_type=jnp.float32) + b3  # [TB, 128]

    # lane-masked select instead of slice + concat: lanes 0:4 = mu,
    # lanes 4:8 = exp(clip(log_std)), lanes 8:128 = 0 (lane-dense store)
    out = jnp.where(lane < ACTION_DIM, head,
                    jnp.exp(jnp.clip(head, -20.0, 2.0)))
    out_ref[...] = jnp.where(lane < 2 * ACTION_DIM, out, 0.0)


def _actor_forward_impl(mtobss, z_context, slab):
    B = mtobss.shape[0]
    xin = jnp.concatenate([mtobss, z_context], axis=-1)              # [B, 32]

    # batch grid: tiles of up to MAX_TILE_B rows, parallel across TensorCores;
    # the weight slab has a constant index_map so it is DMA'd once.
    tile_b = min(MAX_TILE_B, _round_up(B, 8))
    padded = _round_up(B, tile_b)
    if padded != B:
        xin = jnp.pad(xin, ((0, padded - B), (0, 0)))

    out = pl.pallas_call(
        actor_kernel,
        out_shape=jax.ShapeDtypeStruct((padded, SLAB_LANES), jnp.float32),
        grid=(padded // tile_b,),
        in_specs=[
            pl.BlockSpec((tile_b, POLICY_IN), lambda i: (i, 0)),
            pl.BlockSpec((SLAB_ROWS, SLAB_LANES), lambda i: (0, 0)),
        ],
        out_specs=pl.BlockSpec((tile_b, SLAB_LANES), lambda i: (i, 0)),
        compiler_params=pltpu.CompilerParams(
            dimension_semantics=("parallel",)),
    )(xin, slab)

    head = out[:B, :2 * ACTION_DIM]
    return head[:, :ACTION_DIM], head[:, ACTION_DIM:]


actor_forward = jax.jit(_actor_forward_impl)


# ------------------------- deterministic parameter init ----------------------
def init_params(key):
    def dense(k, shape, scale=0.1):
        return scale * jax.random.normal(k, shape, dtype=jnp.float32)

    ks = jax.random.split(key, 11)
    wexp = dense(ks[0], (NUM_EXPERTS, MTOBS_DIM, DIM_MIX))
    bexp = dense(ks[1], (NUM_EXPERTS, 1, DIM_MIX))
    wa = dense(ks[2], (DIM_CTX, NUM_EXPERTS))
    ba = dense(ks[3], (1, NUM_EXPERTS))
    w1z = dense(ks[4], (DIM_CTX, HIDDEN))
    w1m = dense(ks[5], (DIM_MIX, HIDDEN))
    b1 = dense(ks[6], (1, HIDDEN))
    w2 = dense(ks[7], (HIDDEN, HIDDEN))
    b2 = dense(ks[8], (1, HIDDEN))
    w3 = dense(ks[9], (HIDDEN, 2 * ACTION_DIM))     # kept unsplit (fused head)
    b3 = dense(ks[10], (1, 2 * ACTION_DIM))
    return (wexp, bexp, wa, ba, w1z, w1m, b1, w2, b2, w3, b3)


def pack_params(params):
    """Pack all parameters into one lane-aligned [SLAB_ROWS, 128] f32 slab."""
    # TODO(synk): on v6e/v7x store the slab in bf16 (cast at the dot inputs)
    # to halve DMA/VMEM; kept f32 here to preserve the tight reference check.
    (wexp, bexp, wa, ba, w1z, w1m, b1, w2, b2, w3, b3) = params

    # [K, 16, 16] -> [16, K*16] with expert k in lanes k*16:(k+1)*16
    # (transpose first so an ordinary reshape does NOT interleave experts)
    wexp_flat = jnp.transpose(wexp, (1, 0, 2)).reshape(MTOBS_DIM, S1_ENC)
    bexp_flat = bexp.reshape(1, S1_ENC)

    # fused stage-1 weight: input = [mtobss | z], output = [enc_all | logits | h1_z | 0]
    W1 = jnp.zeros((POLICY_IN, SLAB_LANES), dtype=jnp.float32)
    W1 = W1.at[:MTOBS_DIM, :S1_ENC].set(wexp_flat)                        # x -> experts
    W1 = W1.at[MTOBS_DIM:, S1_ENC:S1_ENC + S1_LOG].set(wa)                # z -> logits
    W1 = W1.at[MTOBS_DIM:, S1_ENC + S1_LOG:S1_COLS].set(w1z)              # z -> h1 z-part
    b1_big = jnp.zeros((SLAB_LANES,), dtype=jnp.float32)
    b1_big = b1_big.at[:S1_ENC].set(bexp_flat[0])
    b1_big = b1_big.at[S1_ENC:S1_ENC + S1_LOG].set(ba[0])
    b1_big = b1_big.at[S1_ENC + S1_LOG:S1_COLS].set(b1[0])

    # 0/1 expert-expansion matrix: E[k, k*16:(k+1)*16] = 1
    E = jnp.zeros((NUM_EXPERTS, SLAB_LANES), dtype=jnp.float32)
    E = E.at[:, :S1_ENC].set(
        jnp.kron(jnp.eye(NUM_EXPERTS, dtype=jnp.float32),
                 jnp.ones((1, DIM_MIX), dtype=jnp.float32)))

    # W1M: rows 0:64 = w1m tiled per expert (block-sum folded into the matmul),
    #      rows 68:100 = identity pass-through for the z-part of layer 1.
    W1M = jnp.zeros((SLAB_LANES, SLAB_LANES), dtype=jnp.float32)
    W1M = W1M.at[:S1_ENC, :HIDDEN].set(jnp.tile(w1m, (NUM_EXPERTS, 1)))
    W1M = W1M.at[S1_ENC + S1_LOG:S1_COLS, :HIDDEN].set(
        jnp.eye(HIDDEN, dtype=jnp.float32))

    W2b = jnp.zeros((SLAB_LANES, SLAB_LANES), dtype=jnp.float32)
    W2b = W2b.at[:HIDDEN, :HIDDEN].set(w2)
    b2b = jnp.zeros((SLAB_LANES,), dtype=jnp.float32).at[:HIDDEN].set(b2[0])

    W3b = jnp.zeros((SLAB_LANES, SLAB_LANES), dtype=jnp.float32)
    W3b = W3b.at[:HIDDEN, :2 * ACTION_DIM].set(w3)
    b3b = jnp.zeros((SLAB_LANES,), dtype=jnp.float32).at[:2 * ACTION_DIM].set(b3[0])

    slab = jnp.zeros((SLAB_ROWS, SLAB_LANES), dtype=jnp.float32)
    slab = slab.at[ROW_W1:ROW_W1 + POLICY_IN].set(W1)
    slab = slab.at[ROW_B1].set(b1_big)
    slab = slab.at[ROW_E:ROW_E + NUM_EXPERTS].set(E)
    slab = slab.at[ROW_W1M:ROW_W1M + SLAB_LANES].set(W1M)
    slab = slab.at[ROW_W2:ROW_W2 + SLAB_LANES].set(W2b)
    slab = slab.at[ROW_B2].set(b2b)
    slab = slab.at[ROW_W3:ROW_W3 + SLAB_LANES].set(W3b)
    slab = slab.at[ROW_B3].set(b3b)
    return slab


# ------------------------------ pure-JAX reference ---------------------------
def actor_forward_ref(mtobss, z, params):
    (wexp, bexp, wa, ba, w1z, w1m, b1, w2, b2, w3, b3) = params
    logits = z @ wa + ba
    attn = jax.nn.softmax(logits, axis=-1)
    enc = jax.nn.relu(jnp.einsum('bd,kdm->bkm', mtobss, wexp) + bexp[:, 0][None])
    mix = jnp.einsum('bk,bkm->bm', attn, enc)
    h1 = jax.nn.relu(z @ w1z + mix @ w1m + b1)
    h2 = jax.nn.relu(h1 @ w2 + b2)
    head = h2 @ w3 + b3
    mu = head[:, :ACTION_DIM]
    log_std = jnp.clip(head[:, ACTION_DIM:], -20.0, 2.0)
    return mu, jnp.exp(log_std)


# ------------------------------------ main ------------------------------------
if __name__ == "__main__":
    key = jax.random.PRNGKey(0)
    k_in, k_z, k_p = jax.random.split(key, 3)

    mtobss = jax.random.normal(k_in, (BATCH, MTOBS_DIM), dtype=jnp.float32)
    z_context = jax.random.normal(k_z, (BATCH, DIM_CTX), dtype=jnp.float32)
    params = init_params(k_p)
    slab = pack_params(params)

    mu, std = actor_forward(mtobss, z_context, slab)
    jax.block_until_ready((mu, std))

    mu_ref, std_ref = actor_forward_ref(mtobss, z_context, params)
    # slightly relaxed vs 1e-5: the fused block-sum changes f32 summation order
    assert np.allclose(np.asarray(mu), np.asarray(mu_ref),
                       atol=1e-4, rtol=1e-4), "mu mismatch"
    assert np.allclose(np.asarray(std), np.asarray(std_ref),
                       atol=1e-4, rtol=1e-4), "std mismatch"

    print("KERNEL_OK")
</pallas_src>

<mosaic_0001>
module attributes {stable_mosaic.version = 11 : i64} {
  func.func @actor_kernel(%arg0: i32, %arg1: memref<8x32xf32, #tpu.memory_space<vmem>>, %arg2: memref<448x128xf32, #tpu.memory_space<vmem>>, %arg3: memref<8x128xf32, #tpu.memory_space<vmem>>) attributes {dimension_semantics = [#tpu.dimension_semantics<parallel>], iteration_bounds = array<i64: 1>, scalar_prefetch = 0 : i64, scratch_operands = 0 : i64, tpu.core_type = #tpu.core_type<tc>, window_params = [{transform_indices = @transform_0, window_bounds = array<i64: 8, 32>}, {pipeline_mode = #tpu.pipeline_mode<synchronous>, transform_indices = @transform_1, window_bounds = array<i64: 448, 128>}, {transform_indices = @transform_2, window_bounds = array<i64: 8, 128>}]} {
    %c0 = arith.constant 0 : index
    %c0_0 = arith.constant 0 : index
    %0 = vector.load %arg1[%c0, %c0_0] : memref<8x32xf32, #tpu.memory_space<vmem>>, vector<8x32xf32>
    %c0_1 = arith.constant 0 : index
    %c0_2 = arith.constant 0 : index
    %1 = vector.load %arg2[%c0_1, %c0_2] : memref<448x128xf32, #tpu.memory_space<vmem>>, vector<32x128xf32>
    %c32 = arith.constant 32 : index
    %c0_3 = arith.constant 0 : index
    %2 = vector.load %arg2[%c32, %c0_3] : memref<448x128xf32, #tpu.memory_space<vmem>>, vector<1x128xf32>
    %c40 = arith.constant 40 : index
    %c0_4 = arith.constant 0 : index
    %3 = vector.load %arg2[%c40, %c0_4] : memref<448x128xf32, #tpu.memory_space<vmem>>, vector<4x128xf32>
    %c48 = arith.constant 48 : index
    %c0_5 = arith.constant 0 : index
    %4 = vector.load %arg2[%c48, %c0_5] : memref<448x128xf32, #tpu.memory_space<vmem>>, vector<128x128xf32>
    %c176 = arith.constant 176 : index
    %c0_6 = arith.constant 0 : index
    %5 = vector.load %arg2[%c176, %c0_6] : memref<448x128xf32, #tpu.memory_space<vmem>>, vector<128x128xf32>
    %c304 = arith.constant 304 : index
    %c0_7 = arith.constant 0 : index
    %6 = vector.load %arg2[%c304, %c0_7] : memref<448x128xf32, #tpu.memory_space<vmem>>, vector<1x128xf32>
    %c312 = arith.constant 312 : index
    %c0_8 = arith.constant 0 : index
    %7 = vector.load %arg2[%c312, %c0_8] : memref<448x128xf32, #tpu.memory_space<vmem>>, vector<128x128xf32>
    %c440 = arith.constant 440 : index
    %c0_9 = arith.constant 0 : index
    %8 = vector.load %arg2[%c440, %c0_9] : memref<448x128xf32, #tpu.memory_space<vmem>>, vector<1x128xf32>
    %9 = tpu.iota {dimensions = array<i32: 1>} : vector<8x128xi32>
    %cst = arith.constant dense<0.000000e+00> : vector<8x128xf32>
    %10 = tpu.matmul %0, %1, %cst {dimension_numbers = #tpu.dot_dimension_numbers<[1], [0], [0], [1], [0, 0, 1, 1], [], []>} : vector<8x32xf32>, vector<32x128xf32>, vector<8x128xf32> -> vector<8x128xf32>
    %11 = vector.broadcast %2 : vector<1x128xf32> to vector<8x128xf32>
    %12 = arith.addf %10, %11 : vector<8x128xf32>
    %13 = vector.extract_strided_slice %12 {offsets = [0, 64], sizes = [8, 4], strides = [1, 1]} : vector<8x128xf32> to vector<8x4xf32>
    %cst_10 = arith.constant dense<0xFF800000> : vector<8xf32>
    %14 = vector.multi_reduction <maximumf>, %13, %cst_10 [1] : vector<8x4xf32> to vector<8xf32>
    %15 = vector.shape_cast %14 : vector<8xf32> to vector<8x1xf32>
    %16 = vector.broadcast %15 : vector<8x1xf32> to vector<8x4xf32>
    %17 = arith.subf %13, %16 : vector<8x4xf32>
    %18 = math.exp %17 : vector<8x4xf32>
    %cst_11 = arith.constant dense<0.000000e+00> : vector<8xf32>
    %19 = vector.multi_reduction <add>, %18, %cst_11 [1] : vector<8x4xf32> to vector<8xf32>
    %20 = vector.shape_cast %19 : vector<8xf32> to vector<8x1xf32>
    %21 = vector.broadcast %20 : vector<8x1xf32> to vector<8x4xf32>
    %22 = arith.divf %18, %21 : vector<8x4xf32>
    %cst_12 = arith.constant dense<0.000000e+00> : vector<8x128xf32>
    %23 = tpu.matmul %22, %3, %cst_12 {dimension_numbers = #tpu.dot_dimension_numbers<[1], [0], [0], [1], [0, 0, 1, 1], [], []>} : vector<8x4xf32>, vector<4x128xf32>, vector<8x128xf32> -> vector<8x128xf32>
    %c64_i32 = arith.constant 64 : i32
    %24 = vector.broadcast %c64_i32 : i32 to vector<8x128xi32>
    %25 = arith.cmpi slt, %9, %24 : vector<8x128xi32>
    %cst_13 = arith.constant 0.000000e+00 : f32
    %26 = vector.broadcast %cst_13 : f32 to vector<8x128xf32>
    %27 = arith.maximumf %12, %26 : vector<8x128xf32>
    %28 = arith.mulf %23, %27 : vector<8x128xf32>
    %29 = arith.select %25, %28, %12 : vector<8x128xi1>, vector<8x128xf32>
    %cst_14 = arith.constant dense<0.000000e+00> : vector<8x128xf32>
    %30 = tpu.matmul %29, %4, %cst_14 {dimension_numbers = #tpu.dot_dimension_numbers<[1], [0], [0], [1], [0, 0, 1, 1], [], []>} : vector<8x128xf32>, vector<128x128xf32>, vector<8x128xf32> -> vector<8x128xf32>
    %cst_15 = arith.constant 0.000000e+00 : f32
    %31 = vector.broadcast %cst_15 : f32 to vector<8x128xf32>
    %32 = arith.maximumf %30, %31 : vector<8x128xf32>
    %cst_16 = arith.constant dense<0.000000e+00> : vector<8x128xf32>
    %33 = tpu.matmul %32, %5, %cst_16 {dimension_numbers = #tpu.dot_dimension_numbers<[1], [0], [0], [1], [0, 0, 1, 1], [], []>} : vector<8x128xf32>, vector<128x128xf32>, vector<8x128xf32> -> vector<8x128xf32>
    %34 = vector.broadcast %6 : vector<1x128xf32> to vector<8x128xf32>
    %35 = arith.addf %33, %34 : vector<8x128xf32>
    %cst_17 = arith.constant 0.000000e+00 : f32
    %36 = vector.broadcast %cst_17 : f32 to vector<8x128xf32>
    %37 = arith.maximumf %35, %36 : vector<8x128xf32>
    %cst_18 = arith.constant dense<0.000000e+00> : vector<8x128xf32>
    %38 = tpu.matmul %37, %7, %cst_18 {dimension_numbers = #tpu.dot_dimension_numbers<[1], [0], [0], [1], [0, 0, 1, 1], [], []>} : vector<8x128xf32>, vector<128x128xf32>, vector<8x128xf32> -> vector<8x128xf32>
    %39 = vector.broadcast %8 : vector<1x128xf32> to vector<8x128xf32>
    %40 = arith.addf %38, %39 : vector<8x128xf32>
    %c4_i32 = arith.constant 4 : i32
    %41 = vector.broadcast %c4_i32 : i32 to vector<8x128xi32>
    %42 = arith.cmpi slt, %9, %41 : vector<8x128xi32>
    %cst_19 = arith.constant -2.000000e+01 : f32
    %cst_20 = arith.constant 2.000000e+00 : f32
    %43 = vector.broadcast %cst_19 : f32 to vector<8x128xf32>
    %44 = arith.maximumf %43, %40 : vector<8x128xf32>
    %45 = vector.broadcast %cst_20 : f32 to vector<8x128xf32>
    %46 = arith.minimumf %45, %44 : vector<8x128xf32>
    %47 = math.exp %46 : vector<8x128xf32>
    %48 = arith.select %42, %40, %47 : vector<8x128xi1>, vector<8x128xf32>
    %c8_i32 = arith.constant 8 : i32
    %49 = vector.broadcast %c8_i32 : i32 to vector<8x128xi32>
    %50 = arith.cmpi slt, %9, %49 : vector<8x128xi32>
    %cst_21 = arith.constant 0.000000e+00 : f32
    %51 = vector.broadcast %cst_21 : f32 to vector<8x128xf32>
    %52 = arith.select %50, %48, %51 : vector<8x128xi1>, vector<8x128xf32>
    %c0_22 = arith.constant 0 : index
    %c0_23 = arith.constant 0 : index
    %53 = vector.load %arg3[%c0_22, %c0_23] : memref<8x128xf32, #tpu.memory_space<vmem>>, vector<8x128xf32>
    tpu.vector_store %arg3[%c0_22, %c0_23], %52 {strides = array<i32>} : memref<8x128xf32, #tpu.memory_space<vmem>>, vector<8x128xf32>,
    return
  }
  func.func @transform_0(%arg0: i32) -> (i32, i32) {
    %c0_i32 = arith.constant 0 : i32
    %c0_i32_0 = arith.constant 0 : i32
    return %arg0, %c0_i32 : i32, i32
  }
  func.func @transform_1(%arg0: i32) -> (i32, i32) {
    %c0_i32 = arith.constant 0 : i32
    %c0_i32_0 = arith.constant 0 : i32
    %c0_i32_1 = arith.constant 0 : i32
    return %c0_i32, %c0_i32_0 : i32, i32
  }
  func.func @transform_2(%arg0: i32) -> (i32, i32) {
    %c0_i32 = arith.constant 0 : i32
    %c0_i32_0 = arith.constant 0 : i32
    return %arg0, %c0_i32 : i32, i32
  }
}

</mosaic_0001>

<bundles_post_ra>
// kernel: _actor_forward_impl.1
= control target key start
LH: loop header
LB: loop body
LE: loop exit
PB: predicated region body
PF: predicated region fallthrough
CT: control target
= control target key end

     0   :  { %7 = vsyncpa [#allocation3], 0  ;;  %s715_s9 = smov [#allocation2]   ;;  %s823_s0 = inlined_call_operand.vmem [shape: f32[8,32], index: 0, kind: input, shape index: {}]   ;;  %s824_s1 = inlined_call_operand.hbm [shape: f32[448,128], index: 1, kind: input, shape index: {}]   ;;  %s825_s2 = inlined_call_operand.vmem [shape: f32[8,128], index: 2, kind: output, shape index: {}]  }
   0x1   :  { %s15_s10 = sshll.u32 %s715_s9, 4  ;;  %s16_s10 = int_to_ptr.vmem [resolvable:$true] %s15_s10 }
   0x2   :  { %s701_s11 = scalar_lea.vmem %s16_s10, 7168  ;;  %p706_p1 = scmp.lt.s32.totalorder %s16_s10, %s16_s10 }
   0x3   :  { %p702_p0 = scmp.ne.s32.totalorder %s16_s10, %s701_s11  ;;  %p707_p2 = scmp.lt.s32.totalorder %s701_s11, %s701_s11 }
   0x5   :  { %p708_p3 = por %p707_p2, %p706_p1 }
   0x7   :  { %p709_p4 = pnand %p708_p3, %p702_p0 }
   0x9   :  { %712 = shalt.err (!%p709_p4)
}
   0xa   :  { %s716_s12 = smov 128   ;;  %s717_s13 = smov 8  }
   0xb   :  { %21 = dma.hbm_to_vmem [thread:$0]  %s824_s1, 7168, %s16_s10, [#allocation3], %s716_s12, %s716_s12, %s717_s13  }
   0xc   :  { %713 = dma.done.wait [#allocation3], 7168  }
   0xd   :  { %714 = vsyncadd [#allocation3], 4294960128  ;;  %v718_v0 = vmov 0.0   ;;  %vm719_vm0 = vmmov 0   ;;  %v29_v1 = vld [vmem:[#allocation2 + $0x18] sm:$0xff]  ;;  %v28_v2 = vld [vmem:[#allocation2 + $0x10] sm:$0xff]  ;;  %v82_v52 = vlaneseq }
   0xe   :  { %560 = vmatprep.subr.mxu0 %v718_v0  ;;  %568 = vmatprep.mubr.msk.f32.mxu0 %vm719_vm0, %v718_v0  ;;  %v27_v3 = vld [vmem:[#allocation2 + $0x8] sm:$0xff]  ;;  %v26_v4 = vld [vmem:[#allocation2] sm:$0xff]  ;;  %vm88_vm1 = vcmask 261120   ;;  %vm162_vm2 = vcmask 556544   ;;  %vm173_vm3 = vcmask 31744   ;;  %vm184_vm4 = vcmask 1043456  }
   0xf   :  { %576 = vmatprep.subr.mxu1 %v718_v0  ;;  %608 = vmatprep.mubr.msk.f32.mxu1 %vm719_vm0, %v718_v0  ;;  %v25_v5 = vld [vmem:[%s823_s0] sm:$0xff]  ;;  %s720_s0 = smov 64   ;;  %v31_v17 = vld [vmem:[#allocation2 + $0x28] sm:$0xf]  ;;  %v45_v21 = vld [vmem:[#allocation2 + $0x98] sm:$0xff]  ;;  %v795_v53 = vand.u32 127, %v82_v52 }
  0x10   :  { %561 = vmatpush3.msra.mxu0 %v29_v1  ;;  %v496_v6 = vld [vmem:[#allocation2 + $0x20] ss:$0 sm:$0xff]  ;;  %v47_v19 = vld [vmem:[#allocation2 + $0xa8] sm:$0xff]  ;;  %v44_v22 = vld [vmem:[#allocation2 + $0x90] sm:$0xff] }
  0x11   :  { %562 = vmatprep.subr.mxu0 %v718_v0  ;;  %v46_v20 = vld [vmem:[#allocation2 + $0xa0] sm:$0xff]  ;;  %577 = vmatpush3.msra.mxu1 %v47_v19  ;;  %v43_v23 = vld [vmem:[#allocation2 + $0x88] sm:$0xff]  ;;  %v41_v26 = vld [vmem:[#allocation2 + $0x78] sm:$0xff]  ;;  %vm258_vm5 = vcmp.lt.s32.totalorder %v795_v53, 64  ;;  %vm482_vm6 = vcmp.lt.s32.totalorder %v795_v53, 4  ;;  %vm488_vm7 = vcmp.lt.s32.totalorder %v795_v53, 8 }
  0x12   :  { %563 = vmatpush3.msra.mxu0 %v28_v2  ;;  %578 = vmatprep.subr.mxu1 %v718_v0  ;;  %v42_v24 = vld [vmem:[#allocation2 + $0x80] sm:$0xff]  ;;  %v40_v28 = vld [vmem:[#allocation2 + $0x70] sm:$0xff]  ;;  %v39_v29 = vld [vmem:[#allocation2 + $0x68] sm:$0xff] }
  0x13   :  { %564 = vmatprep.subr.mxu0 %v718_v0  ;;  %579 = vmatpush3.msra.mxu1 %v46_v20  ;;  %v38_v30 = vld [vmem:[#allocation2 + $0x60] sm:$0xff]  ;;  %v37_v31 = vld [vmem:[#allocation2 + $0x58] sm:$0xff]  ;;  %v36_v32 = vld [vmem:[#allocation2 + $0x50] sm:$0xff] }
  0x14   :  { %565 = vmatpush3.msra.mxu0 %v27_v3  ;;  %580 = vmatprep.subr.mxu1 %v718_v0  ;;  %v35_v33 = vld [vmem:[#allocation2 + $0x48] sm:$0xff]  ;;  %v34_v34 = vld [vmem:[#allocation2 + $0x40] sm:$0xff]  ;;  %v33_v36 = vld [vmem:[#allocation2 + $0x38] sm:$0xff] }
  0x15   :  { %566 = vmatprep.subr.mxu0 %v718_v0  ;;  %581 = vmatpush3.msra.mxu1 %v45_v21  ;;  %v32_v37 = vld [vmem:[#allocation2 + $0x30] sm:$0xff]  ;;  %v63_v38 = vld [vmem:[#allocation2 + $0x128] sm:$0xff]  ;;  %v62_v39 = vld [vmem:[#allocation2 + $0x120] sm:$0xff] }
  0x16   :  { %567 = vmatpush3.msra.mxu0 %v26_v4  ;;  %582 = vmatprep.subr.mxu1 %v718_v0  ;;  %v61_v40 = vld [vmem:[#allocation2 + $0x118] sm:$0xff]  ;;  %v60_v41 = vld [vmem:[#allocation2 + $0x110] sm:$0xff]  ;;  %v59_v42 = vld [vmem:[#allocation2 + $0x108] sm:$0xff] }
  0x17   :  { %569 = vmatmul.mubr.msk.f32.vlgmr.msra.gmra.mxu0 %vm88_vm1, %v25_v5  ;;  %571 = vmatprep.subr.mxu0 %v718_v0  ;;  %v58_v43 = vld [vmem:[#allocation2 + $0x100] sm:$0xff]  ;;  %v57_v44 = vld [vmem:[#allocation2 + $0xf8] sm:$0xff]  ;;  %v56_v45 = vld [vmem:[#allocation2 + $0xf0] sm:$0xff] }
  0x18   :  { %573 = vmatprep.mubr.msk.f32.mxu0 %vm719_vm0, %v718_v0  ;;  %572 = vmatpush3.msk.msra.mxu0 %vm184_vm4, %v31_v17  ;;  %v55_v46 = vld [vmem:[#allocation2 + $0xe8] sm:$0xff]  ;;  %v54_v47 = vld [vmem:[#allocation2 + $0xe0] sm:$0xff]  ;;  %v53_v48 = vld [vmem:[#allocation2 + $0xd8] sm:$0xff] }
  0x19   :  { %611 = vmatprep.subr.mxu0 %v718_v0  ;;  %583 = vmatpush3.msra.mxu1 %v44_v22  ;;  %v52_v49 = vld [vmem:[#allocation2 + $0xd0] sm:$0xff]  ;;  %v51_v50 = vld [vmem:[#allocation2 + $0xc8] sm:$0xff]  ;;  %v50_v51 = vld [vmem:[#allocation2 + $0xc0] sm:$0xff] }
  0x1a   :  { %584 = vmatprep.subr.mxu1 %v718_v0  ;;  %v49_v59 = vld [vmem:[#allocation2 + $0xb8] sm:$0xff]  ;;  %v48_v60 = vld [vmem:[#allocation2 + $0xb0] sm:$0xff]  ;;  %v79_v62 = vld [vmem:[#allocation2 + $0x1a8] sm:$0xff] }
  0x1b   :  { %585 = vmatpush3.msra.mxu1 %v43_v23  ;;  %v80_v61 = vld [vmem:[#allocation2 + $0x1b0] sm:$0xff]  ;;  %v78_v63 = vld [vmem:[#allocation2 + $0x1a0] sm:$0xff]  ;;  %v77_v1 = vld [vmem:[#allocation2 + $0x198] sm:$0xff] }
  0x1c   :  { %586 = vmatprep.subr.mxu1 %v718_v0  ;;  %v76_v2 = vld [vmem:[#allocation2 + $0x190] sm:$0xff]  ;;  %v75_v3 = vld [vmem:[#allocation2 + $0x188] sm:$0xff]  ;;  %v74_v4 = vld [vmem:[#allocation2 + $0x180] sm:$0xff] }
  0x1d   :  { %587 = vmatpush3.msra.mxu1 %v42_v24  ;;  %v73_v5 = vld [vmem:[#allocation2 + $0x178] sm:$0xff]  ;;  %v500_v17 = vld [vmem:[#allocation2 + $0x130] ss:$0 sm:$0xff] }
  0x1e   :  { %588 = vmatprep.subr.mxu1 %v718_v0  ;;  %v501_v22 = vld [vmem:[#allocation2 + $0x1b8] ss:$0 sm:$0xff] }
  0x1f   :  { %589 = vmatpush3.msra.mxu1 %v41_v26 }
  0x20   :  { %590 = vmatprep.subr.mxu1 %v718_v0 }
  0x21   :  { %591 = vmatpush3.msra.mxu1 %v40_v28 }
  0x22   :  { %592 = vmatprep.subr.mxu1 %v718_v0 }
  0x23   :  { %593 = vmatpush3.msra.mxu1 %v39_v29 }
  0x24   :  { %594 = vmatprep.subr.mxu1 %v718_v0 }
  0x25   :  { %595 = vmatpush3.msra.mxu1 %v38_v30 }
  0x26   :  { %596 = vmatprep.subr.mxu1 %v718_v0 }
  0x27   :  { %597 = vmatpush3.msra.mxu1 %v37_v31 }
  0x28   :  { %598 = vmatprep.subr.mxu1 %v718_v0 }
  0x29   :  { %599 = vmatpush3.msra.mxu1 %v36_v32 }
  0x2a   :  { %600 = vmatprep.subr.mxu1 %v718_v0 }
  0x2b   :  { %601 = vmatpush3.msra.mxu1 %v35_v33 }
  0x2c   :  { %602 = vmatprep.subr.mxu1 %v718_v0 }
  0x2d   :  { %603 = vmatpush3.msra.mxu1 %v34_v34 }
  0x2e   :  { %604 = vmatprep.subr.mxu1 %v718_v0 }
  0x2f   :  { %605 = vmatpush3.msra.mxu1 %v33_v36 }
  0x30   :  { %606 = vmatprep.subr.mxu1 %v718_v0 }
  0x31   :  { %607 = vmatpush3.msra.mxu1 %v32_v37 }
  0x32   :  { %646 = vmatprep.subr.mxu1 %v718_v0 }
  0xd7   :  { %v158_v7 = vpop.f32.mrf.mxu0 }
  0xd8   :  { %v754_v8 = vadd.f32 %v496_v6, %v158_v7  ;;  %v72_v6 = vld [vmem:[#allocation2 + $0x170] sm:$0xff]  ;;  %v71_v7 = vld [vmem:[#allocation2 + $0x168] sm:$0xff] }
  0xd9   :  { %v570_v9 = vpop.f32.mrf.mxu0 }
  0xda   :  { %v163_v10 = vsel %vm162_vm2, %v754_v8, -inf  ;;  %v259_v54 = vmax.f32 %v754_v8, 0.0  ;;  %v69_v9 = vld [vmem:[#allocation2 + $0x158] sm:$0xff] }
  0xdb   :  { %164 = vmax.xlane.f32.xlu0 %v163_v10  ;;  %v68_v10 = vld [vmem:[#allocation2 + $0x150] sm:$0xff] }
 0x164   :  { %v165_v11 = vpop.xlane.xlu0 %164 }
 0x165   :  { %v166_v12 = vsub.f32 %v754_v8, %v165_v11 }
 0x167   :  { %v167_v13 = vmul.f32 1.442695, %v166_v12 }
 0x169   :  { %687 = vpow2.f32 %v167_v13 }
 0x176   :  { %v688_v14 = vpop.eup %687 }
 0x177   :  { %170 = vrot.lane.b32.xlu0 %v688_v14, %s720_s0 }
 0x1e9   :  { %v171_v15 = vpop.permute.xlu0 %170 }
 0x1ea   :  { %v174_v16 = vsel %vm173_vm3, %v171_v15, 0.0  ;;  %v66_v15 = vld [vmem:[#allocation2 + $0x140] sm:$0xff] }
 0x1eb   :  { %175 = vadd.xlane.f32.xlu1 %v174_v16  ;;  %v65_v16 = vld [vmem:[#allocation2 + $0x138] sm:$0xff] }
 0x274   :  { %v176_v18 = vpop.xlane.xlu1 %175 }
 0x275   :  { %689 = vrcp.f32 %v176_v18 }
 0x282   :  { %v690_v25 = vpop.eup %689 }
 0x283   :  { %v178_v27 = vmul.f32 %v690_v25, %v688_v14  ;;  %v67_v14 = vld [vmem:[#allocation2 + $0x148] sm:$0xff] }
 0x285   :  { %180 = vrot.lane.b32.xlu1 %v178_v27, %s720_s0 }
 0x2f7   :  { %v181_v35 = vpop.permute.xlu1 %180 }
 0x2f8   :  { %574 = vmatmul.mubr.msk.f32.vlgmr.msra.gmra.mxu0 %vm173_vm3, %v181_v35 }
 0x2f9   :  { %643 = vmatprep.mubr.msk.f32.mxu0 %vm719_vm0, %v718_v0  ;;  %612 = vmatpush3.msra.mxu0 %v63_v38 }
 0x2fa   :  { %613 = vmatprep.subr.mxu0 %v718_v0 }
 0x2fb   :  { %614 = vmatpush3.msra.mxu0 %v62_v39 }
 0x2fc   :  { %615 = vmatprep.subr.mxu0 %v718_v0 }
 0x2fd   :  { %616 = vmatpush3.msra.mxu0 %v61_v40 }
 0x2fe   :  { %617 = vmatprep.subr.mxu0 %v718_v0 }
 0x2ff   :  { %618 = vmatpush3.msra.mxu0 %v60_v41 }
 0x300   :  { %619 = vmatprep.subr.mxu0 %v718_v0 }
 0x301   :  { %620 = vmatpush3.msra.mxu0 %v59_v42 }
 0x302   :  { %621 = vmatprep.subr.mxu0 %v718_v0 }
 0x303   :  { %622 = vmatpush3.msra.mxu0 %v58_v43 }
 0x304   :  { %623 = vmatprep.subr.mxu0 %v718_v0 }
 0x305   :  { %624 = vmatpush3.msra.mxu0 %v57_v44 }
 0x306   :  { %625 = vmatprep.subr.mxu0 %v718_v0 }
 0x307   :  { %626 = vmatpush3.msra.mxu0 %v56_v45 }
 0x308   :  { %627 = vmatprep.subr.mxu0 %v718_v0 }
 0x309   :  { %628 = vmatpush3.msra.mxu0 %v55_v46 }
 0x30a   :  { %629 = vmatprep.subr.mxu0 %v718_v0 }
 0x30b   :  { %630 = vmatpush3.msra.mxu0 %v54_v47 }
 0x30c   :  { %631 = vmatprep.subr.mxu0 %v718_v0 }
 0x30d   :  { %632 = vmatpush3.msra.mxu0 %v53_v48 }
 0x30e   :  { %633 = vmatprep.subr.mxu0 %v718_v0 }
 0x30f   :  { %634 = vmatpush3.msra.mxu0 %v52_v49 }
 0x310   :  { %635 = vmatprep.subr.mxu0 %v718_v0 }
 0x311   :  { %636 = vmatpush3.msra.mxu0 %v51_v50 }
 0x312   :  { %637 = vmatprep.subr.mxu0 %v718_v0 }
 0x313   :  { %638 = vmatpush3.msra.mxu0 %v50_v51 }
 0x314   :  { %639 = vmatprep.subr.mxu0 %v718_v0 }
 0x315   :  { %640 = vmatpush3.msra.mxu0 %v49_v59 }
 0x316   :  { %641 = vmatprep.subr.mxu0 %v718_v0 }
 0x317   :  { %642 = vmatpush3.msra.mxu0 %v48_v60 }
 0x3b8   :  { %v254_v55 = vpop.f32.mrf.mxu0 }
 0x3b9   :  { %v260_v56 = vmul.f32 %v259_v54, %v254_v55 }
 0x3ba   :  { %v575_v57 = vpop.f32.mrf.mxu0 }
 0x3bb   :  { %v261_v58 = vsel %vm258_vm5, %v260_v56, %v754_v8  ;;  %v70_v8 = vld [vmem:[#allocation2 + $0x160] sm:$0xff] }
 0x3bc   :  { %609 = vmatmul.mubr.f32.vlgmr.msra.gmra.mxu1 %v261_v58 }
 0x3bd   :  { %678 = vmatprep.mubr.msk.f32.mxu1 %vm719_vm0, %v718_v0  ;;  %647 = vmatpush3.msra.mxu1 %v80_v61 }
 0x3be   :  { %648 = vmatprep.subr.mxu1 %v718_v0 }
 0x3bf   :  { %649 = vmatpush3.msra.mxu1 %v79_v62 }
 0x3c0   :  { %650 = vmatprep.subr.mxu1 %v718_v0 }
 0x3c1   :  { %651 = vmatpush3.msra.mxu1 %v78_v63 }
 0x3c2   :  { %652 = vmatprep.subr.mxu1 %v718_v0 }
 0x3c3   :  { %653 = vmatpush3.msra.mxu1 %v77_v1 }
 0x3c4   :  { %654 = vmatprep.subr.mxu1 %v718_v0 }
 0x3c5   :  { %655 = vmatpush3.msra.mxu1 %v76_v2 }
 0x3c6   :  { %656 = vmatprep.subr.mxu1 %v718_v0 }
 0x3c7   :  { %657 = vmatpush3.msra.mxu1 %v75_v3 }
 0x3c8   :  { %658 = vmatprep.subr.mxu1 %v718_v0 }
 0x3c9   :  { %659 = vmatpush3.msra.mxu1 %v74_v4 }
 0x3ca   :  { %660 = vmatprep.subr.mxu1 %v718_v0 }
 0x3cb   :  { %661 = vmatpush3.msra.mxu1 %v73_v5 }
 0x3cc   :  { %662 = vmatprep.subr.mxu1 %v718_v0 }
 0x3cd   :  { %663 = vmatpush3.msra.mxu1 %v72_v6 }
 0x3ce   :  { %664 = vmatprep.subr.mxu1 %v718_v0 }
 0x3cf   :  { %665 = vmatpush3.msra.mxu1 %v71_v7 }
 0x3d0   :  { %666 = vmatprep.subr.mxu1 %v718_v0 }
 0x3d1   :  { %667 = vmatpush3.msra.mxu1 %v70_v8 }
 0x3d2   :  { %668 = vmatprep.subr.mxu1 %v718_v0 }
 0x3d3   :  { %669 = vmatpush3.msra.mxu1 %v69_v9 }
 0x3d4   :  { %670 = vmatprep.subr.mxu1 %v718_v0 }
 0x3d5   :  { %671 = vmatpush3.msra.mxu1 %v68_v10 }
 0x3d6   :  { %672 = vmatprep.subr.mxu1 %v718_v0 }
 0x3d7   :  { %673 = vmatpush3.msra.mxu1 %v67_v14 }
 0x3d8   :  { %674 = vmatprep.subr.mxu1 %v718_v0 }
 0x3d9   :  { %675 = vmatpush3.msra.mxu1 %v66_v15 }
 0x3da   :  { %676 = vmatprep.subr.mxu1 %v718_v0 }
 0x3db   :  { %677 = vmatpush3.msra.mxu1 %v65_v16 }
 0x47c   :  { %v328_v11 = vpop.f32.mrf.mxu1 }
 0x47d   :  { %v332_v12 = vmax.f32 %v328_v11, 0.0 }
 0x47e   :  { %v610_v13 = vpop.f32.mrf.mxu1 }
 0x47f   :  { %644 = vmatmul.mubr.f32.vlgmr.msra.gmra.mxu0 %v332_v12 }
 0x53f   :  { %v403_v18 = vpop.f32.mrf.mxu0 }
 0x540   :  { %v404_v19 = vadd.f32 %v500_v17, %v403_v18 }
 0x541   :  { %v645_v20 = vpop.f32.mrf.mxu0 }
 0x542   :  { %v407_v21 = vmax.f32 %v404_v19, 0.0 }
 0x544   :  { %679 = vmatmul.mubr.f32.vlgmr.msra.gmra.mxu1 %v407_v21 }
 0x604   :  { %v478_v23 = vpop.f32.mrf.mxu1 }
 0x605   :  { %v479_v24 = vadd.f32 %v501_v22, %v478_v23 }
 0x606   :  { %v680_v25 = vpop.f32.mrf.mxu1 }
 0x607   :  { %v483_v26 = vmax.f32 %v479_v24, -20.0 }
 0x609   :  { %v484_v27 = vmin.f32 %v483_v26, 2.0 }
 0x60b   :  { %v485_v28 = vmul.f32 1.442695, %v484_v27 }
 0x60d   :  { %691 = vpow2.f32 %v485_v28 }
 0x61a   :  { %v692_v0 = vpop.eup %691 }
 0x61b   :  { %v487_v29 = vsel %vm482_vm6, %v479_v24, %v692_v0 }
 0x61c   :  { %v489_v30 = vsel %vm488_vm7, %v487_v29, 0.0 }
 0x61d   :  { %490 = vst [vmem:[%s825_s2] sm:$0xff] %v489_v30 }
 0x61e   :  { %495 = vsyncpa [#allocation3], 1 }

</bundles_post_ra>
